<compile_context>
chip_gen: v7x
topology: tpu7x:2x2x1
jax: 0.10.0
libtpu: 0.0.40
codegen_flags: <defaults>
</compile_context>

<pallas_src>
import functools

import jax
import jax.numpy as jnp
from jax.experimental import pallas as pl
from jax.experimental.pallas import tpu as pltpu


_LANE = 128
_MAX_TILE_LANES = 32768      # upper cap on the HW DMA tile (lanes)
_MAX_CHUNK_LANES = 512       # inner chunk: (Cout=32, 512) f32 == 16 vregs live


def _vmem_x_tile_budget_bytes():
    """Budget for ONE x-tile buffer (the pipeline double-buffers it)."""
    try:
        cap = pltpu.get_tpu_info().vmem_capacity_bytes
    except Exception:  # CPU trace / interpret / older jax: v7x-safe fallback
        cap = 64 * 1024 * 1024
    # Keep 2x x-tile + weights + scratch far below the scoped-VMEM default.
    return max(1 << 20, cap // 16)


def _pick_batch_tile(batch, cin):
    """Smallest tB dividing B with tB*Cin a multiple of 8 (sublane-dense rows)."""
    best = 1
    for tb in range(1, batch + 1):
        if batch % tb:
            continue
        if tb * cin > 64:
            break
        best = tb
        if (tb * cin) % 8 == 0:
            return tb
    return best


def _pick_hw_tile(hw, rows, itemsize):
    """Largest lane-dense tile dividing HW within the VMEM x-tile budget."""
    if hw % _LANE != 0:
        return hw                        # full extent is always a legal block
    budget = _vmem_x_tile_budget_bytes()
    max_lanes = max(_LANE, (budget // (rows * itemsize)) // _LANE * _LANE)
    cap = min(hw, max_lanes, _MAX_TILE_LANES)
    if hw <= cap:
        return hw
    t = cap - cap % _LANE
    while t >= _LANE:
        if hw % t == 0:
            return t
        t -= _LANE
    return hw


def _pick_chunk(t_hw):
    """Inner lane-chunk size; bounds the live (Cout, chunk) intermediate."""
    for c in (_MAX_CHUNK_LANES, 256, 128):
        if t_hw % c == 0:
            return c, True               # lane-foldable into 128-lane accumulator
    for c in range(min(_MAX_CHUNK_LANES, t_hw), 0, -1):
        if t_hw % c == 0:
            return c, False              # odd spatial size: per-chunk XLU reduce
    return t_hw, False


def _make_detect_head_kernel(*, t_b, cin, inv_hw, chunk, n_chunks, lane_fold):
    """Kernel body for one (batch-tile, hw-tile) grid step.

    Ref shapes inside the kernel (leading grid dims squeezed by BlockSpecs):
      x_ref   : (tB*Cin, tHW)   NCHW slab, HW lane-dense (f32 or bf16)
      w1t_ref : (Cout, Cin)     1x1 conv weight (transposed), compute dtype
      b1_ref  : (Cout, 1)       1x1 conv bias, f32
      wf_ref  : (Cout, Wpad)    fused [bbox | class] head weight, lane padded
      bf_ref  : (1, Wpad)       fused head bias, lane padded
      out_ref : (tB, Wpad)      fused lane-dense output rows for this batch tile
      acc_ref : (tB, Cout, L)   running pooled sums (L=128 lane-folded, or 1), f32
    """

    def kernel(x_ref, w1t_ref, b1_ref, wf_ref, bf_ref, out_ref, acc_ref):
        hw = pl.program_id(1)
        n_hw = pl.num_programs(1)

        @pl.when(hw == 0)
        def _():
            acc_ref[...] = jnp.zeros_like(acc_ref)

        w1t = w1t_ref[...]                       # (Cout, Cin)
        b1 = b1_ref[...]                         # (Cout, 1) f32

        def process_chunk(start):
            for i in range(t_b):                 # static, small
                xi = x_ref[pl.ds(i * cin, cin), pl.ds(start, chunk)]  # (Cin, chunk)
                # K == Cin is tiny: keep it off the MXU -> Cin broadcast-FMAs
                # on the VPU with HW on the lane axis.
                h = w1t[:, 0:1] * xi[0:1, :]
                for c in range(1, cin):
                    h = h + w1t[:, c:c + 1] * xi[c:c + 1, :]
                h = jnp.maximum(h.astype(jnp.float32) + b1, 0.0)      # (Cout, chunk)
                if lane_fold:
                    # Fold the chunk to 128 lanes with pure VPU adds; the single
                    # cross-lane XLU reduce happens only in the finalize step.
                    folded = h[:, 0:_LANE]
                    for j in range(1, chunk // _LANE):
                        folded = folded + h[:, j * _LANE:(j + 1) * _LANE]
                    acc_ref[i] = acc_ref[i] + folded
                else:
                    acc_ref[i] = acc_ref[i] + jnp.sum(h, axis=-1, keepdims=True)

        if n_chunks == 1:
            process_chunk(0)
        elif n_chunks <= 8:
            # Fully unrolled; each chunk's h dies at the acc_ref store, so the
            # live set stays <= ~16 vregs even with a large DMA tile.
            for ci in range(n_chunks):
                process_chunk(ci * chunk)
        else:
            def body(ci, carry):
                start = ci * chunk
                if chunk % _LANE == 0:
                    start = pl.multiple_of(start, _LANE)
                process_chunk(start)
                return carry
            jax.lax.fori_loop(0, n_chunks, body, 0, unroll=False)

        # Last HW tile for this batch tile: finish the means, run the fused
        # heads, write one lane-dense (tB, Wpad) output block.
        @pl.when(hw == n_hw - 1)
        def _():
            wf = wf_ref[...]
            bf = bf_ref[...]
            rows = []
            for i in range(t_b):
                if lane_fold:
                    pooled = jnp.sum(acc_ref[i], axis=-1, keepdims=True) * inv_hw
                else:
                    pooled = acc_ref[i] * inv_hw                      # (Cout, 1)
                rows.append(jnp.sum(pooled * wf, axis=0, keepdims=True) + bf)
            out_ref[...] = jnp.concatenate(rows, axis=0).astype(out_ref.dtype)

    return kernel


def prepare_params(params):
    """One-time (init-time) weight prep: transpose, fuse heads, pad to 128 lanes."""
    w1, b1, wb, bb, wc, bc = params
    cin, cout = w1.shape
    a4, anc = wb.shape[1], wc.shape[1]
    w1t = jnp.transpose(w1)                     # (Cout, Cin)
    b1c = jnp.reshape(b1, (cout, 1))            # (Cout, 1)
    wf = jnp.concatenate([wb, wc], axis=1)      # (Cout, A4 + ANC)
    bf = jnp.concatenate([bb, bc], axis=1)      # (1,    A4 + ANC)
    w_out = a4 + anc
    w_pad = ((w_out + _LANE - 1) // _LANE) * _LANE
    if w_pad != w_out:
        wf = jnp.pad(wf, ((0, 0), (0, w_pad - w_out)))
        bf = jnp.pad(bf, ((0, 0), (0, w_pad - w_out)))
    return (w1t, b1c, wf, bf), (a4, anc)


@functools.partial(jax.jit, static_argnames=("tile_hw", "compute_dtype"))
def _forward_fused(x_nchw, w1t, b1c, wf, bf, *, tile_hw=None,
                   compute_dtype=jnp.float32):
    """Runs the detection head; returns the fused, lane-padded (B, Wpad) output."""
    batch, cin, hgt, wid = x_nchw.shape
    cout = w1t.shape[0]
    w_pad = wf.shape[1]
    hw = hgt * wid

    t_b = _pick_batch_tile(batch, cin)
    n_b = batch // t_b
    rows = t_b * cin

    # NCHW -> (B//tB, tB*Cin, HW) is a *pure reshape* (no transpose, no HBM pass).
    x = x_nchw.reshape(n_b, rows, hw)

    if compute_dtype != jnp.float32:
        # bf16 contraction (v6e/v7x VPUs): halves the x HBM traffic and the VALU
        # work on the binding slot; pooled-sum accumulation stays f32.
        x = x.astype(compute_dtype)
        w1t = w1t.astype(compute_dtype)

    t_hw = _pick_hw_tile(hw, rows, x.dtype.itemsize) if tile_hw is None else tile_hw
    assert hw % t_hw == 0, (hw, t_hw)
    n_hw = hw // t_hw
    chunk, lane_fold = _pick_chunk(t_hw)
    n_chunks = t_hw // chunk
    acc_lanes = _LANE if lane_fold else 1

    kernel = _make_detect_head_kernel(
        t_b=t_b, cin=cin, inv_hw=1.0 / float(hw), chunk=chunk,
        n_chunks=n_chunks, lane_fold=lane_fold)

    flops = (2 * batch * hw * cin * cout + 3 * batch * hw * cout
             + 2 * batch * cout * w_pad)
    bytes_accessed = (x.size * x.dtype.itemsize
                      + w1t.size * w1t.dtype.itemsize
                      + 4 * (b1c.size + wf.size + bf.size + batch * w_pad))

    out = pl.pallas_call(
        kernel,
        out_shape=jax.ShapeDtypeStruct((n_b, t_b, w_pad), jnp.float32),
        grid=(n_b, n_hw),
        in_specs=[
            pl.BlockSpec((None, rows, t_hw), lambda b, h: (b, 0, h)),   # x
            pl.BlockSpec((cout, cin), lambda b, h: (0, 0)),             # w1t
            pl.BlockSpec((cout, 1), lambda b, h: (0, 0)),               # b1
            pl.BlockSpec((cout, w_pad), lambda b, h: (0, 0)),           # wf
            pl.BlockSpec((1, w_pad), lambda b, h: (0, 0)),              # bf
        ],
        out_specs=pl.BlockSpec((None, t_b, w_pad), lambda b, h: (b, 0, 0)),
        scratch_shapes=[pltpu.VMEM((t_b, cout, acc_lanes), jnp.float32)],
        compiler_params=pltpu.CompilerParams(
            dimension_semantics=("parallel", "arbitrary"),
            vmem_limit_bytes=32 * 1024 * 1024),
        cost_estimate=pl.CostEstimate(
            flops=int(flops), transcendentals=0,
            bytes_accessed=int(bytes_accessed)),
    )(x, w1t, b1c, wf, bf)

    return out.reshape(batch, w_pad)


def onnx_model_forward(x_nchw, prepped, head_dims, tile_hw=None,
                       compute_dtype=jnp.float32):
    """Mimics ONNXModel.forward for the 2-output (detection) case.

    x_nchw: (B, Cin, H, W) float32
    returns: (bounding_boxes (B, A, 4), class_scores (B, A, NC))
    """
    a4, anc = head_dims
    assert a4 % 4 == 0, "bbox head width must be 4 * num_anchors"
    n_anchors = a4 // 4
    assert anc % n_anchors == 0, "class head width must be anchors * classes"
    n_classes = anc // n_anchors

    w1t, b1c, wf, bf = prepped
    out = _forward_fused(x_nchw, w1t, b1c, wf, bf, tile_hw=tile_hw,
                         compute_dtype=compute_dtype)
    bbox = out[:, :a4].reshape(-1, n_anchors, 4)
    cls = out[:, a4:a4 + anc].reshape(-1, n_anchors, n_classes)
    return bbox, cls


def reference_forward(x_nchw, params):
    """Pure-JAX reference of the same synthetic detection head."""
    w1, b1, wb, bb, wc, bc = params
    b, cin, h, w = x_nchw.shape
    x = jnp.transpose(x_nchw, (0, 2, 3, 1)).reshape(b, h * w, cin)
    hh = jnp.maximum(jnp.einsum("bpc,cd->bpd", x, w1) + b1, 0.0)
    pooled = jnp.mean(hh, axis=1)
    bbox = pooled @ wb + bb
    cls = pooled @ wc + bc
    n_anchors = wb.shape[1] // 4
    n_classes = wc.shape[1] // n_anchors
    return bbox.reshape(b, n_anchors, 4), cls.reshape(b, n_anchors, n_classes)


def init_params(key, cin=4, cout=32, num_anchors=8, num_classes=16):
    k1, k2, k3 = jax.random.split(key, 3)
    w1 = 0.1 * jax.random.normal(k1, (cin, cout), jnp.float32)
    b1 = jnp.zeros((1, cout), jnp.float32)
    wb = 0.1 * jax.random.normal(k2, (cout, num_anchors * 4), jnp.float32)
    bb = jnp.zeros((1, num_anchors * 4), jnp.float32)
    wc = 0.1 * jax.random.normal(k3, (cout, num_anchors * num_classes),
                                 jnp.float32)
    bc = jnp.zeros((1, num_anchors * num_classes), jnp.float32)
    return (w1, b1, wb, bb, wc, bc)


if __name__ == "__main__":
    key = jax.random.PRNGKey(0)
    kx, kx2, kp = jax.random.split(key, 3)

    params = init_params(kp)
    prepped, head_dims = prepare_params(params)   # one-time weight prep

    # Small NCHW input consistent with an image-detection ONNX model.
    x = jax.random.normal(kx, (2, 4, 16, 16), jnp.float32)

    # Auto tile: single HW step, batch folded (tB=2 -> 8 sublane-dense rows).
    bounding_boxes, class_scores = onnx_model_forward(x, prepped, head_dims)
    jax.block_until_ready((bounding_boxes, class_scores))

    # Force multiple HW tiles: exercises the pooled-sum accumulator across steps.
    bb2, cs2 = onnx_model_forward(x, prepped, head_dims, tile_hw=128)

    # Larger spatial map: exercises the inner lane-chunk loop (chunk=512).
    x_big = jax.random.normal(kx2, (2, 4, 32, 32), jnp.float32)
    bb3, cs3 = onnx_model_forward(x_big, prepped, head_dims)

    # Optional bf16 contraction (intended for v6e/v7x; numerically looser).
    bb4, cs4 = onnx_model_forward(x, prepped, head_dims,
                                  compute_dtype=jnp.bfloat16)
    jax.block_until_ready((bb2, cs2, bb3, cs3, bb4, cs4))

    ref_bb, ref_cs = reference_forward(x, params)
    ref_bb_big, ref_cs_big = reference_forward(x_big, params)

    assert bounding_boxes.shape == (2, 8, 4)
    assert class_scores.shape == (2, 8, 16)
    assert bounding_boxes.dtype == jnp.float32
    assert class_scores.dtype == jnp.float32
    assert jnp.allclose(bounding_boxes, ref_bb, rtol=1e-4, atol=1e-5)
    assert jnp.allclose(class_scores, ref_cs, rtol=1e-4, atol=1e-5)
    assert jnp.allclose(bb2, ref_bb, rtol=1e-4, atol=1e-5)
    assert jnp.allclose(cs2, ref_cs, rtol=1e-4, atol=1e-5)
    assert jnp.allclose(bb3, ref_bb_big, rtol=1e-4, atol=1e-5)
    assert jnp.allclose(cs3, ref_cs_big, rtol=1e-4, atol=1e-5)
    assert jnp.allclose(bb4, ref_bb, rtol=5e-2, atol=5e-2)
    assert jnp.allclose(cs4, ref_cs, rtol=5e-2, atol=5e-2)

    print("KERNEL_OK")
</pallas_src>

<mosaic_0001>
module attributes {stable_mosaic.version = 11 : i64} {
  func.func @kernel(%arg0: i32, %arg1: i32, %arg2: memref<1x8x256xf32, #tpu.memory_space<vmem>>, %arg3: memref<32x4xf32, #tpu.memory_space<vmem>>, %arg4: memref<32x1xf32, #tpu.memory_space<vmem>>, %arg5: memref<32x256xf32, #tpu.memory_space<vmem>>, %arg6: memref<1x256xf32, #tpu.memory_space<vmem>>, %arg7: memref<1x2x256xf32, #tpu.memory_space<vmem>>, %arg8: memref<2x32x128xf32, #tpu.memory_space<vmem>>) attributes {dimension_semantics = [#tpu.dimension_semantics<parallel>, #tpu.dimension_semantics<arbitrary>], iteration_bounds = array<i64: 1, 1>, scalar_prefetch = 0 : i64, scratch_operands = 1 : i64, tpu.core_type = #tpu.core_type<tc>, window_params = [{transform_indices = @transform_0, window_bounds = array<i64: 1, 8, 256>}, {pipeline_mode = #tpu.pipeline_mode<synchronous>, transform_indices = @transform_1, window_bounds = array<i64: 32, 4>}, {pipeline_mode = #tpu.pipeline_mode<synchronous>, transform_indices = @transform_2, window_bounds = array<i64: 32, 1>}, {pipeline_mode = #tpu.pipeline_mode<synchronous>, transform_indices = @transform_3, window_bounds = array<i64: 32, 256>}, {pipeline_mode = #tpu.pipeline_mode<synchronous>, transform_indices = @transform_4, window_bounds = array<i64: 1, 256>}, {transform_indices = @transform_5, window_bounds = array<i64: 1, 2, 256>}]} {
    %c0_i32 = arith.constant 0 : i32
    %0 = arith.cmpi eq, %arg1, %c0_i32 : i32
    %1 = arith.extui %0 : i1 to i32
    %c0_i32_0 = arith.constant 0 : i32
    %2 = arith.cmpi ne, %1, %c0_i32_0 : i32
    scf.if %2 {
      %cst_23 = arith.constant 0.000000e+00 : f32
      %84 = vector.broadcast %cst_23 : f32 to vector<2x32x128xf32>
      %c0_24 = arith.constant 0 : index
      %c0_25 = arith.constant 0 : index
      %c0_26 = arith.constant 0 : index
      %85 = vector.load %arg8[%c0_24, %c0_25, %c0_26] : memref<2x32x128xf32, #tpu.memory_space<vmem>>, vector<2x32x128xf32>
      tpu.vector_store %arg8[%c0_24, %c0_25, %c0_26], %84 {strides = array<i32>} : memref<2x32x128xf32, #tpu.memory_space<vmem>>, vector<2x32x128xf32>,
    } else {
    }
    %c0 = arith.constant 0 : index
    %c0_1 = arith.constant 0 : index
    %3 = vector.load %arg3[%c0, %c0_1] : memref<32x4xf32, #tpu.memory_space<vmem>>, vector<32x4xf32>
    %c0_2 = arith.constant 0 : index
    %c0_3 = arith.constant 0 : index
    %4 = vector.load %arg4[%c0_2, %c0_3] : memref<32x1xf32, #tpu.memory_space<vmem>>, vector<32x1xf32>
    %c0_4 = arith.constant 0 : index
    %c0_5 = arith.constant 0 : index
    %c0_6 = arith.constant 0 : index
    %5 = vector.load %arg2[%c0_4, %c0_5, %c0_6] : memref<1x8x256xf32, #tpu.memory_space<vmem>>, vector<1x4x256xf32>
    %6 = vector.shape_cast %5 : vector<1x4x256xf32> to vector<4x256xf32>
    %7 = vector.extract_strided_slice %3 {offsets = [0, 0], sizes = [32, 1], strides = [1, 1]} : vector<32x4xf32> to vector<32x1xf32>
    %8 = vector.extract_strided_slice %6 {offsets = [0, 0], sizes = [1, 256], strides = [1, 1]} : vector<4x256xf32> to vector<1x256xf32>
    %9 = vector.broadcast %7 : vector<32x1xf32> to vector<32x256xf32>
    %10 = vector.broadcast %8 : vector<1x256xf32> to vector<32x256xf32>
    %11 = arith.mulf %9, %10 : vector<32x256xf32>
    %12 = vector.extract_strided_slice %3 {offsets = [0, 1], sizes = [32, 1], strides = [1, 1]} : vector<32x4xf32> to vector<32x1xf32>
    %13 = vector.extract_strided_slice %6 {offsets = [1, 0], sizes = [1, 256], strides = [1, 1]} : vector<4x256xf32> to vector<1x256xf32>
    %14 = vector.broadcast %12 : vector<32x1xf32> to vector<32x256xf32>
    %15 = vector.broadcast %13 : vector<1x256xf32> to vector<32x256xf32>
    %16 = arith.mulf %14, %15 : vector<32x256xf32>
    %17 = arith.addf %11, %16 : vector<32x256xf32>
    %18 = vector.extract_strided_slice %3 {offsets = [0, 2], sizes = [32, 1], strides = [1, 1]} : vector<32x4xf32> to vector<32x1xf32>
    %19 = vector.extract_strided_slice %6 {offsets = [2, 0], sizes = [1, 256], strides = [1, 1]} : vector<4x256xf32> to vector<1x256xf32>
    %20 = vector.broadcast %18 : vector<32x1xf32> to vector<32x256xf32>
    %21 = vector.broadcast %19 : vector<1x256xf32> to vector<32x256xf32>
    %22 = arith.mulf %20, %21 : vector<32x256xf32>
    %23 = arith.addf %17, %22 : vector<32x256xf32>
    %24 = vector.extract_strided_slice %3 {offsets = [0, 3], sizes = [32, 1], strides = [1, 1]} : vector<32x4xf32> to vector<32x1xf32>
    %25 = vector.extract_strided_slice %6 {offsets = [3, 0], sizes = [1, 256], strides = [1, 1]} : vector<4x256xf32> to vector<1x256xf32>
    %26 = vector.broadcast %24 : vector<32x1xf32> to vector<32x256xf32>
    %27 = vector.broadcast %25 : vector<1x256xf32> to vector<32x256xf32>
    %28 = arith.mulf %26, %27 : vector<32x256xf32>
    %29 = arith.addf %23, %28 : vector<32x256xf32>
    %30 = vector.broadcast %4 : vector<32x1xf32> to vector<32x256xf32>
    %31 = arith.addf %29, %30 : vector<32x256xf32>
    %cst = arith.constant 0.000000e+00 : f32
    %32 = vector.broadcast %cst : f32 to vector<32x256xf32>
    %33 = arith.maximumf %31, %32 : vector<32x256xf32>
    %34 = vector.extract_strided_slice %33 {offsets = [0, 0], sizes = [32, 128], strides = [1, 1]} : vector<32x256xf32> to vector<32x128xf32>
    %35 = vector.extract_strided_slice %33 {offsets = [0, 128], sizes = [32, 128], strides = [1, 1]} : vector<32x256xf32> to vector<32x128xf32>
    %36 = arith.addf %34, %35 : vector<32x128xf32>
    %c0_7 = arith.constant 0 : index
    %c0_8 = arith.constant 0 : index
    %c0_9 = arith.constant 0 : index
    %37 = vector.load %arg8[%c0_7, %c0_8, %c0_9] : memref<2x32x128xf32, #tpu.memory_space<vmem>>, vector<1x32x128xf32>
    %38 = vector.shape_cast %37 : vector<1x32x128xf32> to vector<32x128xf32>
    %39 = arith.addf %38, %36 : vector<32x128xf32>
    %c0_10 = arith.constant 0 : index
    %c0_11 = arith.constant 0 : index
    %c0_12 = arith.constant 0 : index
    %40 = vector.load %arg8[%c0_10, %c0_11, %c0_12] : memref<2x32x128xf32, #tpu.memory_space<vmem>>, vector<1x32x128xf32>
    %41 = vector.shape_cast %40 : vector<1x32x128xf32> to vector<32x128xf32>
    %42 = vector.shape_cast %39 : vector<32x128xf32> to vector<1x32x128xf32>
    tpu.vector_store %arg8[%c0_10, %c0_11, %c0_12], %42 {strides = array<i32>} : memref<2x32x128xf32, #tpu.memory_space<vmem>>, vector<1x32x128xf32>,
    %c0_13 = arith.constant 0 : index
    %c4 = arith.constant 4 : index
    %c0_14 = arith.constant 0 : index
    %43 = vector.load %arg2[%c0_13, %c4, %c0_14] : memref<1x8x256xf32, #tpu.memory_space<vmem>>, vector<1x4x256xf32>
    %44 = vector.shape_cast %43 : vector<1x4x256xf32> to vector<4x256xf32>
    %45 = vector.extract_strided_slice %3 {offsets = [0, 0], sizes = [32, 1], strides = [1, 1]} : vector<32x4xf32> to vector<32x1xf32>
    %46 = vector.extract_strided_slice %44 {offsets = [0, 0], sizes = [1, 256], strides = [1, 1]} : vector<4x256xf32> to vector<1x256xf32>
    %47 = vector.broadcast %45 : vector<32x1xf32> to vector<32x256xf32>
    %48 = vector.broadcast %46 : vector<1x256xf32> to vector<32x256xf32>
    %49 = arith.mulf %47, %48 : vector<32x256xf32>
    %50 = vector.extract_strided_slice %3 {offsets = [0, 1], sizes = [32, 1], strides = [1, 1]} : vector<32x4xf32> to vector<32x1xf32>
    %51 = vector.extract_strided_slice %44 {offsets = [1, 0], sizes = [1, 256], strides = [1, 1]} : vector<4x256xf32> to vector<1x256xf32>
    %52 = vector.broadcast %50 : vector<32x1xf32> to vector<32x256xf32>
    %53 = vector.broadcast %51 : vector<1x256xf32> to vector<32x256xf32>
    %54 = arith.mulf %52, %53 : vector<32x256xf32>
    %55 = arith.addf %49, %54 : vector<32x256xf32>
    %56 = vector.extract_strided_slice %3 {offsets = [0, 2], sizes = [32, 1], strides = [1, 1]} : vector<32x4xf32> to vector<32x1xf32>
    %57 = vector.extract_strided_slice %44 {offsets = [2, 0], sizes = [1, 256], strides = [1, 1]} : vector<4x256xf32> to vector<1x256xf32>
    %58 = vector.broadcast %56 : vector<32x1xf32> to vector<32x256xf32>
    %59 = vector.broadcast %57 : vector<1x256xf32> to vector<32x256xf32>
    %60 = arith.mulf %58, %59 : vector<32x256xf32>
    %61 = arith.addf %55, %60 : vector<32x256xf32>
    %62 = vector.extract_strided_slice %3 {offsets = [0, 3], sizes = [32, 1], strides = [1, 1]} : vector<32x4xf32> to vector<32x1xf32>
    %63 = vector.extract_strided_slice %44 {offsets = [3, 0], sizes = [1, 256], strides = [1, 1]} : vector<4x256xf32> to vector<1x256xf32>
    %64 = vector.broadcast %62 : vector<32x1xf32> to vector<32x256xf32>
    %65 = vector.broadcast %63 : vector<1x256xf32> to vector<32x256xf32>
    %66 = arith.mulf %64, %65 : vector<32x256xf32>
    %67 = arith.addf %61, %66 : vector<32x256xf32>
    %68 = vector.broadcast %4 : vector<32x1xf32> to vector<32x256xf32>
    %69 = arith.addf %67, %68 : vector<32x256xf32>
    %cst_15 = arith.constant 0.000000e+00 : f32
    %70 = vector.broadcast %cst_15 : f32 to vector<32x256xf32>
    %71 = arith.maximumf %69, %70 : vector<32x256xf32>
    %72 = vector.extract_strided_slice %71 {offsets = [0, 0], sizes = [32, 128], strides = [1, 1]} : vector<32x256xf32> to vector<32x128xf32>
    %73 = vector.extract_strided_slice %71 {offsets = [0, 128], sizes = [32, 128], strides = [1, 1]} : vector<32x256xf32> to vector<32x128xf32>
    %74 = arith.addf %72, %73 : vector<32x128xf32>
    %c1 = arith.constant 1 : index
    %c0_16 = arith.constant 0 : index
    %c0_17 = arith.constant 0 : index
    %75 = vector.load %arg8[%c1, %c0_16, %c0_17] : memref<2x32x128xf32, #tpu.memory_space<vmem>>, vector<1x32x128xf32>
    %76 = vector.shape_cast %75 : vector<1x32x128xf32> to vector<32x128xf32>
    %77 = arith.addf %76, %74 : vector<32x128xf32>
    %c1_18 = arith.constant 1 : index
    %c0_19 = arith.constant 0 : index
    %c0_20 = arith.constant 0 : index
    %78 = vector.load %arg8[%c1_18, %c0_19, %c0_20] : memref<2x32x128xf32, #tpu.memory_space<vmem>>, vector<1x32x128xf32>
    %79 = vector.shape_cast %78 : vector<1x32x128xf32> to vector<32x128xf32>
    %80 = vector.shape_cast %77 : vector<32x128xf32> to vector<1x32x128xf32>
    tpu.vector_store %arg8[%c1_18, %c0_19, %c0_20], %80 {strides = array<i32>} : memref<2x32x128xf32, #tpu.memory_space<vmem>>, vector<1x32x128xf32>,
    %c0_i32_21 = arith.constant 0 : i32
    %81 = arith.cmpi eq, %arg1, %c0_i32_21 : i32
    %82 = arith.extui %81 : i1 to i32
    %c0_i32_22 = arith.constant 0 : i32
    %83 = arith.cmpi ne, %82, %c0_i32_22 : i32
    scf.if %83 {
      %c0_23 = arith.constant 0 : index
      %c0_24 = arith.constant 0 : index
      %84 = vector.load %arg5[%c0_23, %c0_24] : memref<32x256xf32, #tpu.memory_space<vmem>>, vector<32x256xf32>
      %c0_25 = arith.constant 0 : index
      %c0_26 = arith.constant 0 : index
      %85 = vector.load %arg6[%c0_25, %c0_26] : memref<1x256xf32, #tpu.memory_space<vmem>>, vector<1x256xf32>
      %c0_27 = arith.constant 0 : index
      %c0_28 = arith.constant 0 : index
      %c0_29 = arith.constant 0 : index
      %86 = vector.load %arg8[%c0_27, %c0_28, %c0_29] : memref<2x32x128xf32, #tpu.memory_space<vmem>>, vector<1x32x128xf32>
      %87 = vector.shape_cast %86 : vector<1x32x128xf32> to vector<32x128xf32>
      %cst_30 = arith.constant dense<0.000000e+00> : vector<32xf32>
      %88 = vector.multi_reduction <add>, %87, %cst_30 [1] : vector<32x128xf32> to vector<32xf32>
      %89 = vector.shape_cast %88 : vector<32xf32> to vector<32x1xf32>
      %cst_31 = arith.constant 3.906250e-03 : f32
      %90 = vector.broadcast %cst_31 : f32 to vector<32x1xf32>
      %91 = arith.mulf %89, %90 : vector<32x1xf32>
      %92 = vector.broadcast %91 : vector<32x1xf32> to vector<32x256xf32>
      %93 = arith.mulf %92, %84 : vector<32x256xf32>
      %cst_32 = arith.constant dense<0.000000e+00> : vector<256xf32>
      %94 = vector.multi_reduction <add>, %93, %cst_32 [0] : vector<32x256xf32> to vector<256xf32>
      %95 = vector.shape_cast %94 : vector<256xf32> to vector<1x256xf32>
      %96 = arith.addf %95, %85 : vector<1x256xf32>
      %c1_33 = arith.constant 1 : index
      %c0_34 = arith.constant 0 : index
      %c0_35 = arith.constant 0 : index
      %97 = vector.load %arg8[%c1_33, %c0_34, %c0_35] : memref<2x32x128xf32, #tpu.memory_space<vmem>>, vector<1x32x128xf32>
      %98 = vector.shape_cast %97 : vector<1x32x128xf32> to vector<32x128xf32>
      %cst_36 = arith.constant dense<0.000000e+00> : vector<32xf32>
      %99 = vector.multi_reduction <add>, %98, %cst_36 [1] : vector<32x128xf32> to vector<32xf32>
      %100 = vector.shape_cast %99 : vector<32xf32> to vector<32x1xf32>
      %cst_37 = arith.constant 3.906250e-03 : f32
      %101 = vector.broadcast %cst_37 : f32 to vector<32x1xf32>
      %102 = arith.mulf %100, %101 : vector<32x1xf32>
      %103 = vector.broadcast %102 : vector<32x1xf32> to vector<32x256xf32>
      %104 = arith.mulf %103, %84 : vector<32x256xf32>
      %cst_38 = arith.constant dense<0.000000e+00> : vector<256xf32>
      %105 = vector.multi_reduction <add>, %104, %cst_38 [0] : vector<32x256xf32> to vector<256xf32>
      %106 = vector.shape_cast %105 : vector<256xf32> to vector<1x256xf32>
      %107 = arith.addf %106, %85 : vector<1x256xf32>
      %108 = tpu.concatenate %96, %107 in 0 : vector<1x256xf32>, vector<1x256xf32> -> vector<2x256xf32>
      %c0_39 = arith.constant 0 : index
      %c0_40 = arith.constant 0 : index
      %c0_41 = arith.constant 0 : index
      %109 = vector.load %arg7[%c0_39, %c0_40, %c0_41] : memref<1x2x256xf32, #tpu.memory_space<vmem>>, vector<1x2x256xf32>
      %110 = vector.shape_cast %109 : vector<1x2x256xf32> to vector<2x256xf32>
      %111 = vector.shape_cast %108 : vector<2x256xf32> to vector<1x2x256xf32>
      tpu.vector_store %arg7[%c0_39, %c0_40, %c0_41], %111 {strides = array<i32>} : memref<1x2x256xf32, #tpu.memory_space<vmem>>, vector<1x2x256xf32>,
    } else {
    }
    return
  }
  func.func @transform_0(%arg0: i32, %arg1: i32) -> (i32, i32, i32) {
    %c0_i32 = arith.constant 0 : i32
    %c0_i32_0 = arith.constant 0 : i32
    return %arg0, %c0_i32, %arg1 : i32, i32, i32
  }
  func.func @transform_1(%arg0: i32, %arg1: i32) -> (i32, i32) {
    %c0_i32 = arith.constant 0 : i32
    %c0_i32_0 = arith.constant 0 : i32
    %c0_i32_1 = arith.constant 0 : i32
    return %c0_i32, %c0_i32_0 : i32, i32
  }
  func.func @transform_2(%arg0: i32, %arg1: i32) -> (i32, i32) {
    %c0_i32 = arith.constant 0 : i32
    %c0_i32_0 = arith.constant 0 : i32
    %c0_i32_1 = arith.constant 0 : i32
    return %c0_i32, %c0_i32_0 : i32, i32
  }
  func.func @transform_3(%arg0: i32, %arg1: i32) -> (i32, i32) {
    %c0_i32 = arith.constant 0 : i32
    %c0_i32_0 = arith.constant 0 : i32
    %c0_i32_1 = arith.constant 0 : i32
    return %c0_i32, %c0_i32_0 : i32, i32
  }
  func.func @transform_4(%arg0: i32, %arg1: i32) -> (i32, i32) {
    %c0_i32 = arith.constant 0 : i32
    %c0_i32_0 = arith.constant 0 : i32
    %c0_i32_1 = arith.constant 0 : i32
    return %c0_i32, %c0_i32_0 : i32, i32
  }
  func.func @transform_5(%arg0: i32, %arg1: i32) -> (i32, i32, i32) {
    %c0_i32 = arith.constant 0 : i32
    %c0_i32_0 = arith.constant 0 : i32
    %c0_i32_1 = arith.constant 0 : i32
    return %arg0, %c0_i32, %c0_i32_0 : i32, i32, i32
  }
}

</mosaic_0001>

<bundles_post_ra>
// kernel: _forward_fused.1
= control target key start
LH: loop header
LB: loop body
LE: loop exit
PB: predicated region body
PF: predicated region fallthrough
CT: control target
= control target key end

     0   :  { %v563_v1 = vmov 1   ;;  %v564_v2 = vmov 0   ;;  %s821_s0 = inlined_call_operand.vmem [shape: f32[1,8,256], index: 0, kind: input, shape index: {}]   ;;  %s822_s1 = inlined_call_operand.vmem [shape: f32[32,4], index: 1, kind: input, shape index: {}]   ;;  %s823_s2 = inlined_call_operand.vmem [shape: f32[32,1], index: 2, kind: input, shape index: {}]   ;;  %s824_s3 = inlined_call_operand.vmem [shape: f32[32,256], index: 3, kind: input, shape index: {}]   ;;  %s825_s4 = inlined_call_operand.vmem [shape: f32[1,256], index: 4, kind: input, shape index: {}]   ;;  %s826_s5 = inlined_call_operand.hbm [shape: f32[1,2,256], index: 5, kind: output, shape index: {}]  }
   0x1   :  { %v33_v0 = vld [vmem:[%s822_s1] sm:$0xff]  ;;  %527 = vset.pattern.permute.xlu1 %v563_v1  ;;  %526 = vset.pattern.permute.xlu0 %v564_v2  ;;  %v34_v3 = vld [vmem:[%s822_s1 + $0x8] sm:$0xff] }
   0x2   :  { %80 = vperm.xlu1 %527, %v33_v0   ;;  %45 = vperm.xlu0 %526, %v33_v0  }
   0x3   :  { %10 = vsyncpa [#allocation4], 0  ;;  %v35_v4 = vld [vmem:[%s822_s1 + $0x10] sm:$0xff]  ;;  %v565_v5 = vmov 2   ;;  %v36_v6 = vld [vmem:[%s822_s1 + $0x18] sm:$0xff]  ;;  %v566_v7 = vmov 3   ;;  %v63_v14 = vlaneseq }
   0x4   :  { %v38_v8 = vld [vmem:[%s823_s2 + $0x8] sm:$0xff]  ;;  %v37_v9 = vld [vmem:[%s823_s2] sm:$0xff]  ;;  %v39_v10 = vld [vmem:[%s823_s2 + $0x10] sm:$0xff]  ;;  %vm491_vm0 = vcmask 1040384  }
   0x5   :  { %v40_v11 = vld [vmem:[%s823_s2 + $0x18] sm:$0xff]  ;;  %v64_v17 = vshrl.u32 %v63_v14, 7  ;;  %v41_v22 = vld [vmem:[%s821_s0] sm:$0xf]  ;;  %v42_v23 = vld [vmem:[%s821_s0 + $0x8] sm:$0xf] }
   0x6   :  { %84 = vperm.xlu1 %527, %v34_v3   ;;  %50 = vperm.xlu0 %526, %v34_v3   ;;  %v251_v26 = vld [vmem:[%s821_s0] sm:$0xf0]  ;;  %v252_v27 = vld [vmem:[%s821_s0 + $0x8] sm:$0xf0] }
   0x7   :  { %v626_v20 = vsub.s32 1, %v64_v17  ;;  %v628_v21 = vsub.s32 0, %v64_v17  ;;  %v271_v24 = vsub.s32 5, %v64_v17  ;;  %v255_v25 = vsub.s32 4, %v64_v17 }
   0x8   :  { %v137_v28 = vsub.s32 2, %v64_v17  ;;  %v295_v39 = vsub.s32 6, %v64_v17  ;;  %v177_v42 = vsub.s32 3, %v64_v17  ;;  %v319_v43 = vsub.s32 7, %v64_v17 }
   0x9   :  { %829 = vst [vmem:[#allocation6_spill] sm:$0xff] %v626_v20  ;;  %830 = vst [vmem:[#allocation7_spill] sm:$0xff] %v628_v21  ;;  %v643_v29 = vrot.slane %v41_v22, %v626_v20  ;;  %v646_v30 = vrot.slane %v42_v23, %v626_v20  ;;  %v649_v31 = vrot.slane %v41_v22, %v628_v21 }
   0xa   :  { %88 = vperm.xlu1 %527, %v35_v4   ;;  %55 = vperm.xlu0 %526, %v35_v4   ;;  %v652_v32 = vrot.slane %v42_v23, %v628_v21  ;;  %v656_v35 = vrot.slane %v251_v26, %v271_v24  ;;  %v658_v36 = vrot.slane %v252_v27, %v271_v24 }
   0xb   :  { %v660_v37 = vrot.slane %v251_v26, %v255_v25  ;;  %v662_v38 = vrot.slane %v252_v27, %v255_v25  ;;  %v664_v40 = vrot.slane %v41_v22, %v137_v28  ;;  %v666_v41 = vrot.slane %v42_v23, %v137_v28 }
   0xc   :  { %v684_v58 = vrot.slane %v251_v26, %v295_v39  ;;  %v686_v59 = vrot.slane %v252_v27, %v295_v39  ;;  %v688_v60 = vrot.slane %v41_v22, %v177_v42  ;;  %v690_v61 = vrot.slane %v42_v23, %v177_v42 }
   0xe   :  { %529 = vset.pattern.permute.xlu1 %v565_v5  ;;  %528 = vset.pattern.permute.xlu0 %v565_v5 }
   0xf   :  { %124 = vperm.xlu1 %529, %v34_v3   ;;  %120 = vperm.xlu0 %528, %v33_v0  }
  0x13   :  { %530 = vset.pattern.permute.xlu1 %v564_v2  ;;  %531 = vset.pattern.permute.xlu0 %v563_v1  ;;  %v694_v1 = vrot.slane %v252_v27, %v319_v43 }
  0x14   :  { %60 = vperm.xlu1 %530, %v36_v6   ;;  %92 = vperm.xlu0 %531, %v36_v6  }
  0x18   :  { %532 = vset.pattern.permute.xlu1 %v565_v5  ;;  %534 = vset.pattern.permute.xlu0 %v566_v7 }
  0x19   :  { %128 = vperm.xlu1 %532, %v35_v4   ;;  %164 = vperm.xlu0 %534, %v34_v3  }
  0x1d   :  { %533 = vset.pattern.permute.xlu1 %v566_v7  ;;  %172 = vperm.xlu0 %534, %v36_v6  }
  0x1e   :  { %160 = vperm.xlu1 %533, %v33_v0   ;;  %v692_v0 = vrot.slane %v251_v26, %v319_v43 }
  0x21   :  { %538 = vset.pattern.permute.xlu0 %v564_v2 }
  0x22   :  { %535 = vset.pattern.permute.xlu1 %v565_v5  ;;  %206 = vperm.xlu0 %538, %v38_v8  }
  0x23   :  { %132 = vperm.xlu1 %535, %v36_v6  }
  0x27   :  { %536 = vset.pattern.permute.xlu1 %v566_v7 }
  0x28   :  { %168 = vperm.xlu1 %536, %v35_v4  }
  0x2c   :  { %537 = vset.pattern.permute.xlu1 %v564_v2 }
  0x2d   :  { %201 = vperm.xlu1 %537, %v37_v9  }
  0x31   :  { %211 = vperm.xlu1 %537, %v39_v10  }
  0x35   :  { %216 = vperm.xlu1 %537, %v40_v11  }
  0x81   :  { %v81_v12 = vpop.permute.xlu1 %80  ;;  %v46_v13 = vpop.permute.xlu0 %45 }
  0x82   :  { %v103_v44 = vmul.f32 %v643_v29, %v81_v12  ;;  %v104_v45 = vmul.f32 %v646_v30, %v81_v12  ;;  %v71_v46 = vmul.f32 %v649_v31, %v46_v13  ;;  %v72_v47 = vmul.f32 %v652_v32, %v46_v13 }
  0x83   :  { %v277_v48 = vmul.f32 %v656_v35, %v81_v12  ;;  %v278_v49 = vmul.f32 %v658_v36, %v81_v12  ;;  %v261_v50 = vmul.f32 %v660_v37, %v46_v13  ;;  %v262_v51 = vmul.f32 %v662_v38, %v46_v13 }
  0x84   :  { %v111_v62 = vadd.f32 %v103_v44, %v71_v46  ;;  %v112_v63 = vadd.f32 %v104_v45, %v72_v47 }
  0x85   :  { %v85_v15 = vpop.permute.xlu1 %84  ;;  %v51_v16 = vpop.permute.xlu0 %50  ;;  %v285_v2 = vadd.f32 %v277_v48, %v261_v50  ;;  %v286_v3 = vadd.f32 %v278_v49, %v262_v51 }
  0x86   :  { %v279_v54 = vmul.f32 %v656_v35, %v85_v15  ;;  %v280_v55 = vmul.f32 %v658_v36, %v85_v15  ;;  %v263_v56 = vmul.f32 %v660_v37, %v51_v16  ;;  %v264_v57 = vmul.f32 %v662_v38, %v51_v16 }
  0x87   :  { %v105_v4 = vmul.f32 %v643_v29, %v85_v15  ;;  %v106_v5 = vmul.f32 %v646_v30, %v85_v15  ;;  %v73_v6 = vmul.f32 %v649_v31, %v51_v16  ;;  %v74_v7 = vmul.f32 %v652_v32, %v51_v16 }
  0x88   :  { %v287_v8 = vadd.f32 %v279_v54, %v263_v56  ;;  %v288_v9 = vadd.f32 %v280_v55, %v264_v57 }
  0x89   :  { %v622_v18 = vpop.permute.xlu1 %88  ;;  %v624_v19 = vpop.permute.xlu0 %55  ;;  %v114_v45 = vadd.f32 %v106_v5, %v74_v7 }
  0x8a   :  { %v107_v12 = vmul.f32 %v643_v29, %v622_v18  ;;  %v108_v13 = vmul.f32 %v646_v30, %v622_v18  ;;  %v281_v14 = vmul.f32 %v656_v35, %v622_v18  ;;  %v75_v15 = vmul.f32 %v649_v31, %v624_v19 }
  0x8b   :  { %v76_v17 = vmul.f32 %v652_v32, %v624_v19  ;;  %v265_v16 = vmul.f32 %v660_v37, %v624_v19  ;;  %v282_v24 = vmul.f32 %v658_v36, %v622_v18  ;;  %v266_v25 = vmul.f32 %v662_v38, %v624_v19 }
  0x8c   :  { %v113_v18 = vadd.f32 %v105_v4, %v73_v6  ;;  %v115_v46 = vadd.f32 %v107_v12, %v75_v15 }
  0x8d   :  { %v289_v48 = vadd.f32 %v281_v14, %v265_v16  ;;  %v290_v51 = vadd.f32 %v282_v24, %v266_v25 }
  0x8e   :  { %v125_v33 = vpop.permute.xlu1 %124  ;;  %v654_v34 = vpop.permute.xlu0 %120 }
  0x8f   :  { %v303_v22 = vmul.f32 %v684_v58, %v125_v33  ;;  %v304_v23 = vmul.f32 %v686_v59, %v125_v33  ;;  %v145_v26 = vmul.f32 %v664_v40, %v125_v33  ;;  %v146_v27 = vmul.f32 %v666_v41, %v125_v33 }
  0x90   :  { %v143_v28 = vmul.f32 %v664_v40, %v654_v34  ;;  %v144_v39 = vmul.f32 %v666_v41, %v654_v34  ;;  %v301_v19 = vmul.f32 %v684_v58, %v654_v34  ;;  %v116_v33 = vadd.f32 %v108_v13, %v76_v17 }
  0x91   :  { %v311_v49 = vadd.f32 %v303_v22, %v287_v8  ;;  %v312_v50 = vadd.f32 %v304_v23, %v288_v9  ;;  %v153_v54 = vadd.f32 %v145_v26, %v113_v18  ;;  %v154_v55 = vadd.f32 %v146_v27, %v114_v45 }
  0x92   :  { %v302_v56 = vmul.f32 %v686_v59, %v654_v34  ;;  %v151_v57 = vadd.f32 %v143_v28, %v111_v62  ;;  %v152_v20 = vadd.f32 %v144_v39, %v112_v63  ;;  %v309_v5 = vadd.f32 %v301_v19, %v285_v2 }
  0x93   :  { %v676_v52 = vpop.permute.xlu1 %60  ;;  %v678_v53 = vpop.permute.xlu0 %92 }
  0x94   :  { %v77_v6 = vmul.f32 %v649_v31, %v676_v52  ;;  %v78_v7 = vmul.f32 %v652_v32, %v676_v52  ;;  %v267_v8 = vmul.f32 %v660_v37, %v676_v52  ;;  %v268_v12 = vmul.f32 %v662_v38, %v676_v52 }
  0x95   :  { %v109_v34 = vmul.f32 %v643_v29, %v678_v53  ;;  %v110_v31 = vmul.f32 %v646_v30, %v678_v53  ;;  %v283_v32 = vmul.f32 %v656_v35, %v678_v53  ;;  %v284_v37 = vmul.f32 %v658_v36, %v678_v53 }
  0x97   :  { %v117_v16 = vadd.f32 %v109_v34, %v77_v6  ;;  %v118_v22 = vadd.f32 %v110_v31, %v78_v7  ;;  %v291_v23 = vadd.f32 %v283_v32, %v267_v8 }
  0x98   :  { %v129_v10 = vpop.permute.xlu1 %128  ;;  %v165_v11 = vpop.permute.xlu0 %164 }
  0x99   :  { %v327_v42 = vmul.f32 %v692_v0, %v165_v11  ;;  %v328_v43 = vmul.f32 %v694_v1, %v165_v11  ;;  %v147_v13 = vmul.f32 %v664_v40, %v129_v10  ;;  %v148_v38 = vmul.f32 %v666_v41, %v129_v10 }
  0x9a   :  { %v305_v29 = vmul.f32 %v684_v58, %v129_v10  ;;  %v306_v15 = vmul.f32 %v686_v59, %v129_v10  ;;  %v185_v17 = vmul.f32 %v688_v60, %v165_v11  ;;  %v186_v30 = vmul.f32 %v690_v61, %v165_v11 }
  0x9b   :  { %v335_v21 = vadd.f32 %v327_v42, %v311_v49  ;;  %v336_v4 = vadd.f32 %v328_v43, %v312_v50  ;;  %v155_v27 = vadd.f32 %v147_v13, %v115_v46  ;;  %v156_v10 = vadd.f32 %v148_v38, %v116_v33 }
  0x9c   :  { %v726_v44 = vpop.permute.xlu0 %172  ;;  %v313_v28 = vadd.f32 %v305_v29, %v289_v48  ;;  %v314_v39 = vadd.f32 %v306_v15, %v290_v51  ;;  %v193_v42 = vadd.f32 %v185_v17, %v153_v54  ;;  %v194_v43 = vadd.f32 %v186_v30, %v154_v55 }
  0x9d   :  { %v161_v47 = vpop.permute.xlu1 %160  ;;  %v189_v11 = vmul.f32 %v688_v60, %v726_v44  ;;  %v331_v48 = vmul.f32 %v692_v0, %v726_v44  ;;  %v332_v51 = vmul.f32 %v694_v1, %v726_v44 }
  0x9e   :  { %v325_v35 = vmul.f32 %v692_v0, %v161_v47  ;;  %v326_v36 = vmul.f32 %v694_v1, %v161_v47  ;;  %v183_v24 = vmul.f32 %v688_v60, %v161_v47  ;;  %v184_v25 = vmul.f32 %v690_v61, %v161_v47 }
  0xa0   :  { %v333_v19 = vadd.f32 %v325_v35, %v309_v5  ;;  %v191_v46 = vadd.f32 %v183_v24, %v151_v57  ;;  %v192_v33 = vadd.f32 %v184_v25, %v152_v20 }
  0xa1   :  { %v738_v9 = vpop.permute.xlu0 %206 }
  0xa2   :  { %v133_v62 = vpop.permute.xlu1 %132  ;;  %v343_v63 = vadd.f32 %v335_v21, %v738_v9  ;;  %v344_v2 = vadd.f32 %v336_v4, %v738_v9  ;;  %v310_v21 = vadd.f32 %v302_v56, %v286_v3  ;;  %v292_v3 = vadd.f32 %v284_v37, %v268_v12 }
  0xa3   :  { %v307_v18 = vmul.f32 %v684_v58, %v133_v62  ;;  %v308_v45 = vmul.f32 %v686_v59, %v133_v62  ;;  %v149_v54 = vmul.f32 %v664_v40, %v133_v62  ;;  %v150_v58 = vmul.f32 %v666_v41, %v133_v62 }
  0xa4   :  { %v351_v52 = vmax.f32 %v343_v63, 0.0  ;;  %v352_v14 = vmax.f32 %v344_v2, 0.0  ;;  %v334_v49 = vadd.f32 %v326_v36, %v310_v21  ;;  %v221_v41 = vadd.f32 %v738_v9, %v193_v42 }
  0xa5   :  { %v315_v6 = vadd.f32 %v307_v18, %v291_v23  ;;  %v316_v7 = vadd.f32 %v308_v45, %v292_v3  ;;  %v222_v62 = vadd.f32 %v738_v9, %v194_v43  ;;  %v190_v2 = vmul.f32 %v690_v61, %v726_v44 }
  0xa6   :  { %v358_v53 = vadd.f32 %v352_v14, %v351_v52  ;;  %v158_v13 = vadd.f32 %v150_v58, %v118_v22  ;;  %v229_v35 = vmax.f32 %v221_v41, 0.0 }
  0xa7   :  { %v169_v26 = vpop.permute.xlu1 %168  ;;  %v339_v38 = vadd.f32 %v331_v48, %v315_v6  ;;  %v340_v21 = vadd.f32 %v332_v51, %v316_v7  ;;  %v230_v36 = vmax.f32 %v222_v62, 0.0  ;;  %v380_v48 = vld [vmem:[%s824_s3 + $0x18] sm:$0xff]  ;;  %v381_v51 = vld [vmem:[%s824_s3 + $0x20] sm:$0xff] }
  0xa8   :  { %447 = vadd.xlane.f32.xlu1 %v358_v53  ;;  %v329_v47 = vmul.f32 %v692_v0, %v169_v26  ;;  %v330_v50 = vmul.f32 %v694_v1, %v169_v26  ;;  %v187_v57 = vmul.f32 %v688_v60, %v169_v26  ;;  %v188_v20 = vmul.f32 %v690_v61, %v169_v26 }
  0xa9   :  { %v157_v60 = vadd.f32 %v149_v54, %v117_v16  ;;  %v198_v25 = vadd.f32 %v190_v2, %v158_v13  ;;  %v236_v26 = vadd.f32 %v230_v36, %v229_v35  ;;  %v382_v54 = vld [vmem:[%s824_s3 + $0x28] sm:$0xff] }
  0xaa   :  { %v337_v12 = vadd.f32 %v329_v47, %v313_v28  ;;  %v338_v34 = vadd.f32 %v330_v50, %v314_v39  ;;  %v195_v29 = vadd.f32 %v187_v57, %v155_v27  ;;  %v196_v15 = vadd.f32 %v188_v20, %v156_v10  ;;  %v378_v50 = vld [vmem:[%s824_s3 + $0x8] sm:$0xff]  ;;  %v383_v20 = vld [vmem:[%s824_s3 + $0x30] sm:$0xff] }
  0xab   :  { %v197_v24 = vadd.f32 %v189_v11, %v157_v60  ;;  %v377_v11 = vld [vmem:[%s824_s3] sm:$0xff] }
  0xac   :  { %v202_v55 = vpop.permute.xlu1 %201 }
  0xad   :  { %v341_v59 = vadd.f32 %v333_v19, %v202_v55  ;;  %v342_v56 = vadd.f32 %v334_v49, %v202_v55  ;;  %v219_v4 = vadd.f32 %v202_v55, %v191_v46  ;;  %v220_v5 = vadd.f32 %v202_v55, %v192_v33  ;;  %v379_v46 = vld [vmem:[%s824_s3 + $0x10] sm:$0xff] }
  0xaf   :  { %v349_v8 = vmax.f32 %v341_v59, 0.0  ;;  %v350_v0 = vmax.f32 %v342_v56, 0.0  ;;  %v227_v63 = vmax.f32 %v219_v4, 0.0  ;;  %v228_v40 = vmax.f32 %v220_v5, 0.0 }
  0xb0   :  { %v212_v1 = vpop.permute.xlu1 %211 }
  0xb1   :  { %v357_v31 = vadd.f32 %v350_v0, %v349_v8  ;;  %v345_v32 = vadd.f32 %v337_v12, %v212_v1  ;;  %v346_v37 = vadd.f32 %v338_v34, %v212_v1  ;;  %v235_v30 = vadd.f32 %v228_v40, %v227_v63  ;;  %v384_v8 = vld [vmem:[%s824_s3 + $0x38] sm:$0xff] }
  0xb2   :  { %v223_v9 = vadd.f32 %v212_v1, %v195_v29  ;;  %v224_v44 = vadd.f32 %v212_v1, %v196_v15 }
  0xb3   :  { %445 = vadd.xlane.f32.xlu0 %v357_v31  ;;  %v353_v52 = vmax.f32 %v345_v32, 0.0  ;;  %v354_v14 = vmax.f32 %v346_v37, 0.0 }
  0xb4   :  { %v217_v17 = vpop.permute.xlu1 %216  ;;  %v231_v3 = vmax.f32 %v223_v9, 0.0  ;;  %v232_v28 = vmax.f32 %v224_v44, 0.0 }
  0xb5   :  { %v359_v53 = vadd.f32 %v354_v14, %v353_v52  ;;  %v347_v23 = vadd.f32 %v339_v38, %v217_v17  ;;  %v348_v61 = vadd.f32 %v340_v21, %v217_v17  ;;  %v225_v10 = vadd.f32 %v217_v17, %v197_v24 }
  0xb6   :  { %v226_v39 = vadd.f32 %v217_v17, %v198_v25  ;;  %v237_v42 = vadd.f32 %v232_v28, %v231_v3 }
  0xb7   :  { %390 = vadd.xlane.f32.xlu0 %v235_v30  ;;  %449 = vadd.xlane.f32.xlu1 %v359_v53  ;;  %v355_v16 = vmax.f32 %v347_v23, 0.0  ;;  %v356_v22 = vmax.f32 %v348_v61, 0.0  ;;  %v233_v43 = vmax.f32 %v225_v10, 0.0 }
  0xb8   :  { %v234_v18 = vmax.f32 %v226_v39, 0.0 }
  0xb9   :  { %v360_v27 = vadd.f32 %v356_v22, %v355_v16 }
  0xba   :  { %v238_v45 = vadd.f32 %v234_v18, %v233_v43 }
  0xbb   :  { %392 = vadd.xlane.f32.xlu0 %v236_v26  ;;  %451 = vadd.xlane.f32.xlu1 %v360_v27 }
  0xbf   :  { %394 = vadd.xlane.f32.xlu0 %v237_v42 }
  0xc3   :  { %396 = vadd.xlane.f32.xlu0 %v238_v45 }
 0x135   :  { %v448_v19 = vpop.xlane.xlu1 %447 }
 0x136   :  { %v454_v33 = vmul.f32 0.00390625, %v448_v19  ;;  %v385_v19 = vld [vmem:[%s825_s4] sm:$0x3]  ;;  %s567_s4 = smov [#allocation3]  }
 0x137   :  { %s512_s30 = sshll.u32 %s567_s4, 4  ;;  %s513_s30 = int_to_ptr.vmem [resolvable:$true] %s512_s30 }
 0x138   :  { %v459_v5 = vmul.f32 %v454_v33, %v379_v46  ;;  %v460_v6 = vmul.f32 %v454_v33, %v380_v48  ;;  %s539_s6 = scalar_lea.vmem %s513_s30, 64  ;;  %p544_p1 = scmp.lt.s32.totalorder %s513_s30, %s513_s30 }
 0x139   :  { %p540_p0 = scmp.ne.s32.totalorder %s513_s30, %s539_s6  ;;  %p545_p2 = scmp.lt.s32.totalorder %s539_s6, %s539_s6 }
 0x13b   :  { %p546_p3 = por %p545_p2, %p544_p1 }
 0x13d   :  { %p547_p4 = pnand %p546_p3, %p540_p0 }
 0x140   :  { %v446_v49 = vpop.xlane.xlu0 %445 }
 0x141   :  { %v453_v47 = vmul.f32 0.00390625, %v446_v49 }
 0x143   :  { %v457_v59 = vmul.f32 %v453_v47, %v377_v11  ;;  %v458_v56 = vmul.f32 %v453_v47, %v378_v50 }
 0x144   :  { %v450_v58 = vpop.xlane.xlu1 %449  ;;  %v391_v55 = vpop.xlane.xlu0 %390 }
 0x145   :  { %v455_v4 = vmul.f32 0.00390625, %v450_v58  ;;  %v465_v34 = vadd.f32 %v459_v5, %v457_v59  ;;  %v474_v1 = vadd.f32 %v460_v6, %v458_v56  ;;  %v398_v41 = vmul.f32 0.00390625, %v391_v55 }
 0x147   :  { %v461_v7 = vmul.f32 %v455_v4, %v381_v51  ;;  %v462_v57 = vmul.f32 %v455_v4, %v382_v54  ;;  %v402_v52 = vmul.f32 %v398_v41, %v377_v11  ;;  %v403_v14 = vmul.f32 %v398_v41, %v378_v50  ;;  %v831_v11 = vld [vmem:[#allocation7_spill] sm:$0xff] }
 0x148   :  { %v452_v0 = vpop.xlane.xlu1 %451  ;;  %v393_v12 = vpop.xlane.xlu0 %392  ;;  %v432_v50 = vrot.slane %v385_v19, %v831_v11 }
 0x149   :  { %v456_v63 = vmul.f32 0.00390625, %v452_v0  ;;  %v399_v40 = vmul.f32 0.00390625, %v393_v12  ;;  %v466_v62 = vadd.f32 %v465_v34, %v461_v7  ;;  %v475_v2 = vadd.f32 %v474_v1, %v462_v57 }
 0x14b   :  { %v463_v31 = vmul.f32 %v456_v63, %v383_v20  ;;  %v464_v32 = vmul.f32 %v456_v63, %v384_v8  ;;  %v404_v37 = vmul.f32 %v399_v40, %v379_v46  ;;  %v405_v60 = vmul.f32 %v399_v40, %v380_v48  ;;  %v832_v46 = vld [vmem:[#allocation6_spill] sm:$0xff] }
 0x14c   :  { %v395_v13 = vpop.xlane.xlu0 %394  ;;  %v436_v33 = vrot.slane %v385_v19, %v832_v46 }
 0x14d   :  { %v467_v38 = vadd.f32 %v466_v62, %v463_v31  ;;  %v476_v29 = vadd.f32 %v475_v2, %v464_v32  ;;  %v400_v21 = vmul.f32 0.00390625, %v395_v13  ;;  %v410_v30 = vadd.f32 %v404_v37, %v402_v52 }
 0x14e   :  { %v419_v35 = vadd.f32 %v405_v60, %v403_v14 }
 0x14f   :  { %v468_v15 = vrot.slane %v467_v38, 4  ;;  %v477_v17 = vrot.slane %v476_v29, 4  ;;  %v406_v36 = vmul.f32 %v400_v21, %v381_v51  ;;  %v407_v9 = vmul.f32 %v400_v21, %v382_v54 }
 0x150   :  { %v397_v53 = vpop.xlane.xlu0 %396 }
 0x151   :  { %v469_v23 = vadd.f32 %v468_v15, %v467_v38  ;;  %v478_v61 = vadd.f32 %v477_v17, %v476_v29  ;;  %v401_v44 = vmul.f32 0.00390625, %v397_v53  ;;  %v411_v16 = vadd.f32 %v410_v30, %v406_v36 }
 0x152   :  { %v420_v22 = vadd.f32 %v419_v35, %v407_v9 }
 0x153   :  { %v470_v24 = vrot.slane %v469_v23, 2  ;;  %v479_v25 = vrot.slane %v478_v61, 2  ;;  %v408_v26 = vmul.f32 %v401_v44, %v383_v20  ;;  %v409_v3 = vmul.f32 %v401_v44, %v384_v8 }
 0x155   :  { %v471_v27 = vadd.f32 %v470_v24, %v469_v23  ;;  %v480_v28 = vadd.f32 %v479_v25, %v478_v61  ;;  %v412_v10 = vadd.f32 %v411_v16, %v408_v26  ;;  %v421_v39 = vadd.f32 %v420_v22, %v409_v3 }
 0x157   :  { %v472_v42 = vrot.slane %v471_v27, 1  ;;  %v481_v43 = vrot.slane %v480_v28, 1  ;;  %v413_v18 = vrot.slane %v412_v10, 4  ;;  %v422_v45 = vrot.slane %v421_v39, 4 }
 0x159   :  { %v414_v49 = vadd.f32 %v413_v18, %v412_v10  ;;  %v423_v47 = vadd.f32 %v422_v45, %v421_v39  ;;  %v473_v48 = vadd.f32 %v472_v42, %v471_v27  ;;  %v482_v51 = vadd.f32 %v481_v43, %v480_v28 }
 0x15b   :  { %v415_v54 = vrot.slane %v414_v49, 2  ;;  %v424_v58 = vrot.slane %v423_v47, 2  ;;  %v483_v5 = vadd.f32 %v473_v48, %v432_v50  ;;  %v484_v6 = vadd.f32 %v482_v51, %v436_v33 }
 0x15d   :  { %v416_v55 = vadd.f32 %v415_v54, %v414_v49  ;;  %v425_v59 = vadd.f32 %v424_v58, %v423_v47  ;;  %v487_v0 = vrot.slane %v483_v5, 7  ;;  %v488_v12 = vrot.slane %v484_v6, 7 }
 0x15f   :  { %v417_v56 = vrot.slane %v416_v55, 1  ;;  %v426_v4 = vrot.slane %v425_v59, 1 }
 0x161   :  { %v418_v7 = vadd.f32 %v417_v56, %v416_v55  ;;  %v427_v57 = vadd.f32 %v426_v4, %v425_v59 }
 0x163   :  { %v439_v20 = vadd.f32 %v432_v50, %v418_v7  ;;  %v440_v8 = vadd.f32 %v436_v33, %v427_v57 }
 0x165   :  { %v492_v34 = vsel %vm491_vm0, %v439_v20, %v487_v0  ;;  %v493_v1 = vsel %vm491_vm0, %v440_v8, %v488_v12 }
 0x166   :  { %v496_v63 = vcombine.low %v492_v34, %v493_v1 }
 0x168   :  { %520 = vst.sshfl [vmem:[#allocation3] sm:$0x33 pattern:$0x76325410] %v496_v63 }
 0x169   :  { %550 = shalt.err (!%p547_p4)
}
 0x16a   :  { %s551_s9 = scalar_lea.hbm %s826_s5, 64 }
 0x16b   :  { %p552_p5 = scmp.ne.s32.totalorder %s826_s5, %s551_s9  ;;  %p555_p6 = scmp.lt.u32.totalorder %s551_s9, %s826_s5 }
 0x16d   :  { %p557_p7 = pnand %p555_p6, %p552_p5 }
 0x16f   :  { %560 = shalt.err (!%p557_p7)
}
 0x170   :  { %515 = dma.vmem_to_hbm [thread:$0]  %s513_s30, 64, %s826_s5, [#allocation4]  }
 0x171   :  { %561 = dma.done.wait [#allocation4], 64  }
 0x172   :  { %562 = vsyncadd [#allocation4], 4294967232 }
 0x173   :  { %519 = vsyncpa [#allocation4], 1 }

</bundles_post_ra>
